<compile_context>
chip_gen: v7x
topology: tpu7x:2x2x1
jax: 0.10.0
libtpu: 0.0.40
codegen_flags: <defaults>
</compile_context>

<pallas_src>
import jax
import jax.numpy as jnp
from jax.experimental import pallas as pl
from jax.experimental.pallas import tpu as pltpu

NEGATIVE_SLOPE = -0.1
_LANE = 128
_MAX_TILE = 8192  # lane-axis tile cap; keeps double-buffered resident set ~4 MiB


def _convt1x1_where_kernel(x_ref, w_ref, b_ref, o_ref):
    # x_ref: (C_in, T)     channel-major, lane-dense batch*spatial tile
    # w_ref: (C_out, C_in) transposed 1x1 conv weight (tiny, resident)
    # b_ref: (C_out, 1)
    # o_ref: (C_out, T)    lane-dense output tile -> unmasked full-width stores
    v1 = jnp.dot(w_ref[...], x_ref[...],
                 preferred_element_type=jnp.float32) + b_ref[...]
    o_ref[...] = jnp.where(v1 > 0, v1, v1 * NEGATIVE_SLOPE)


def _round_up(x, m):
    return ((x + m - 1) // m) * m


def model_forward(x_nchw, weight, bias):
    """x_nchw: (N, C_in, H, W) f32; weight: (C_in, C_out) f32; bias: (C_out,) f32.
    Returns (N, C_out, H, W) f32 with the same semantics as the PyTorch module."""
    N, C_in, H, W = x_nchw.shape
    C_out = weight.shape[1]
    HW = H * W
    total = N * HW

    # Fold N*HW onto the lane axis: (C_in, N*HW).  Tiny XLA layout op.
    x2d = jnp.transpose(x_nchw, (1, 0, 2, 3)).reshape(C_in, total)

    # Lane-dense tiling: pad lane extent up to a multiple of the tile so the
    # last block is never ragged and stores are always full width.
    tile = min(_MAX_TILE, _round_up(total, _LANE))
    padded = _round_up(total, tile)
    if padded != total:
        x2d = jnp.pad(x2d, ((0, 0), (0, padded - total)))
    grid = (padded // tile,)  # (1,) for the module's 8x19x4x4 input

    w_t = weight.T                 # (C_out, C_in)
    b2d = bias.reshape(C_out, 1)   # broadcast over lanes inside the kernel

    out2d = pl.pallas_call(
        _convt1x1_where_kernel,
        out_shape=jax.ShapeDtypeStruct((C_out, padded), jnp.float32),
        grid_spec=pl.GridSpec(
            grid=grid,
            in_specs=[
                pl.BlockSpec((C_in, tile), lambda s: (0, s)),
                pl.BlockSpec((C_out, C_in), lambda s: (0, 0)),
                pl.BlockSpec((C_out, 1), lambda s: (0, 0)),
            ],
            out_specs=pl.BlockSpec((C_out, tile), lambda s: (0, s)),
        ),
        compiler_params=pltpu.CompilerParams(
            dimension_semantics=("parallel",),
        ),
    )(x2d, w_t, b2d)

    out2d = out2d[:, :total]
    return out2d.reshape(C_out, N, H, W).transpose(1, 0, 2, 3)


if __name__ == "__main__":
    key = jax.random.PRNGKey(0)
    kx, kw, kb = jax.random.split(key, 3)

    # Shapes from the PyTorch module: x2 = torch.randn(8, 19, 4, 4),
    # ConvTranspose2d(19, 64, 1, stride=1, padding=0).
    N, C_in, H, W = 8, 19, 4, 4
    C_out = 64

    x = jax.random.normal(kx, (N, C_in, H, W), dtype=jnp.float32)
    # PyTorch ConvTranspose2d weight is (C_in, C_out, 1, 1); use squeezed 2-D form.
    bound = 1.0 / (C_in ** 0.5)
    weight = jax.random.uniform(kw, (C_in, C_out), dtype=jnp.float32,
                                minval=-bound, maxval=bound)
    bias = jax.random.uniform(kb, (C_out,), dtype=jnp.float32,
                              minval=-bound, maxval=bound)

    out = model_forward(x, weight, bias)
    jax.block_until_ready(out)

    # Pure-JAX reference: 1x1 stride-1 ConvTranspose2d == per-pixel x @ W + b.
    ref_v1 = jnp.einsum("nchw,co->nohw", x, weight) + bias[None, :, None, None]
    ref = jnp.where(ref_v1 > 0, ref_v1, ref_v1 * NEGATIVE_SLOPE)
    assert out.shape == (N, C_out, H, W)
    assert jnp.allclose(out, ref, atol=1e-5, rtol=1e-5)

    print("KERNEL_OK")
</pallas_src>

<mosaic_0001>
module attributes {stable_mosaic.version = 11 : i64} {
  func.func @_convt1x1_where_kernel(%arg0: i32, %arg1: memref<19x128xf32, #tpu.memory_space<vmem>>, %arg2: memref<64x19xf32, #tpu.memory_space<vmem>>, %arg3: memref<64x1xf32, #tpu.memory_space<vmem>>, %arg4: memref<64x128xf32, #tpu.memory_space<vmem>>) attributes {dimension_semantics = [#tpu.dimension_semantics<parallel>], iteration_bounds = array<i64: 1>, scalar_prefetch = 0 : i64, scratch_operands = 0 : i64, tpu.core_type = #tpu.core_type<tc>, window_params = [{transform_indices = @transform_0, window_bounds = array<i64: 19, 128>}, {pipeline_mode = #tpu.pipeline_mode<synchronous>, transform_indices = @transform_1, window_bounds = array<i64: 64, 19>}, {pipeline_mode = #tpu.pipeline_mode<synchronous>, transform_indices = @transform_2, window_bounds = array<i64: 64, 1>}, {transform_indices = @transform_3, window_bounds = array<i64: 64, 128>}]} {
    %c0 = arith.constant 0 : index
    %c0_0 = arith.constant 0 : index
    %0 = vector.load %arg2[%c0, %c0_0] : memref<64x19xf32, #tpu.memory_space<vmem>>, vector<64x19xf32>
    %c0_1 = arith.constant 0 : index
    %c0_2 = arith.constant 0 : index
    %1 = vector.load %arg1[%c0_1, %c0_2] : memref<19x128xf32, #tpu.memory_space<vmem>>, vector<19x128xf32>
    %cst = arith.constant dense<0.000000e+00> : vector<64x128xf32>
    %2 = tpu.matmul %0, %1, %cst {dimension_numbers = #tpu.dot_dimension_numbers<[1], [0], [0], [1], [0, 0, 1, 1], [], []>} : vector<64x19xf32>, vector<19x128xf32>, vector<64x128xf32> -> vector<64x128xf32>
    %c0_3 = arith.constant 0 : index
    %c0_4 = arith.constant 0 : index
    %3 = vector.load %arg3[%c0_3, %c0_4] : memref<64x1xf32, #tpu.memory_space<vmem>>, vector<64x1xf32>
    %4 = vector.broadcast %3 : vector<64x1xf32> to vector<64x128xf32>
    %5 = arith.addf %2, %4 : vector<64x128xf32>
    %cst_5 = arith.constant 0.000000e+00 : f32
    %6 = vector.broadcast %cst_5 : f32 to vector<64x128xf32>
    %7 = arith.cmpf ogt, %5, %6 : vector<64x128xf32>
    %cst_6 = arith.constant -1.000000e-01 : f32
    %8 = vector.broadcast %cst_6 : f32 to vector<64x128xf32>
    %9 = arith.mulf %5, %8 : vector<64x128xf32>
    %10 = arith.select %7, %5, %9 : vector<64x128xi1>, vector<64x128xf32>
    %c0_7 = arith.constant 0 : index
    %c0_8 = arith.constant 0 : index
    %11 = vector.load %arg4[%c0_7, %c0_8] : memref<64x128xf32, #tpu.memory_space<vmem>>, vector<64x128xf32>
    tpu.vector_store %arg4[%c0_7, %c0_8], %10 {strides = array<i32>} : memref<64x128xf32, #tpu.memory_space<vmem>>, vector<64x128xf32>,
    return
  }
  func.func @transform_0(%arg0: i32) -> (i32, i32) {
    %c0_i32 = arith.constant 0 : i32
    %c0_i32_0 = arith.constant 0 : i32
    return %c0_i32, %arg0 : i32, i32
  }
  func.func @transform_1(%arg0: i32) -> (i32, i32) {
    %c0_i32 = arith.constant 0 : i32
    %c0_i32_0 = arith.constant 0 : i32
    %c0_i32_1 = arith.constant 0 : i32
    return %c0_i32, %c0_i32_0 : i32, i32
  }
  func.func @transform_2(%arg0: i32) -> (i32, i32) {
    %c0_i32 = arith.constant 0 : i32
    %c0_i32_0 = arith.constant 0 : i32
    %c0_i32_1 = arith.constant 0 : i32
    return %c0_i32, %c0_i32_0 : i32, i32
  }
  func.func @transform_3(%arg0: i32) -> (i32, i32) {
    %c0_i32 = arith.constant 0 : i32
    %c0_i32_0 = arith.constant 0 : i32
    return %c0_i32, %arg0 : i32, i32
  }
}

</mosaic_0001>

<bundles_post_ra>
// kernel: tpu_custom_call.1
= control target key start
LH: loop header
LB: loop body
LE: loop exit
PB: predicated region body
PF: predicated region fallthrough
CT: control target
= control target key end

     0   :  { %vm74_vm0 = vcmask 154624   ;;  %vm99_vm1 = vcmask 1042432   ;;  %v332_v10 = vmov 0   ;;  %s437_s0 = inlined_call_operand.vmem [shape: f32[19,128], index: 0, kind: input, shape index: {}]   ;;  %s438_s1 = inlined_call_operand.vmem [shape: f32[64,19], index: 1, kind: input, shape index: {}]   ;;  %s439_s2 = inlined_call_operand.vmem [shape: f32[64,1], index: 2, kind: input, shape index: {}]   ;;  %s440_s3 = inlined_call_operand.hbm [shape: f32[64,128], index: 3, kind: output, shape index: {}]  }
   0x1   :  { %v23_v0 = vld [vmem:[%s437_s0] sm:$0xff]  ;;  %v24_v1 = vld [vmem:[%s437_s0 + $0x8] sm:$0xff]  ;;  %v25_v5 = vld [vmem:[%s437_s0 + $0x10] sm:$0x7]  ;;  %307 = vset.pattern.permute.xlu1 %v332_v10  ;;  %306 = vset.pattern.permute.xlu0 %v332_v10 }
   0x2   :  { %v294_v2 = vpack.c.bf16 %v24_v1, %v23_v0  ;;  %v15_v3 = vld [vmem:[%s438_s1] sm:$0xff]  ;;  %v28_v6 = vld [vmem:[%s439_s2 + $0x10] sm:$0xff]  ;;  %v16_v8 = vld [vmem:[%s438_s1 + $0x8] sm:$0xff] }
   0x3   :  { %v19_v4 = vld [vmem:[%s438_s1 + $0x20] sm:$0xff]  ;;  %282 = vmatprep.mubr.msk.f32.mxu0 %vm74_vm0, %v15_v3  ;;  %v20_v9 = vld [vmem:[%s438_s1 + $0x28] sm:$0xff] }
   0x4   :  { %288 = vmatprep.mubr.msk.f32.mxu1 %vm74_vm0, %v19_v4  ;;  %295 = vmatprep.subr.bf16.mxu0 %v294_v2  ;;  %v26_v7 = vld [vmem:[%s439_s2] sm:$0xff] }
   0x5   :  { %298 = vmatprep.subr.bf16.mxu1 %v294_v2  ;;  %297 = vmatpush3.bf16.msra.mxu0 %v294_v2 }
   0x6   :  { %300 = vmatpush3.bf16.msra.mxu1 %v294_v2  ;;  %280 = vmatprep.subr.msk.mxu0 %vm99_vm1, %v25_v5 }
   0x7   :  { %299 = vmatprep.subr.msk.mxu1 %vm99_vm1, %v25_v5 }
   0x8   :  { %8 = vsyncpa [#allocation3], 0  ;;  %v17_v11 = vld [vmem:[%s438_s1 + $0x10] sm:$0xff]  ;;  %46 = vperm.xlu1 %307, %v28_v6   ;;  %36 = vperm.xlu0 %306, %v26_v7   ;;  %v29_v13 = vld [vmem:[%s439_s2 + $0x18] sm:$0xff] }
   0x9   :  { %v21_v12 = vld [vmem:[%s438_s1 + $0x30] sm:$0xff]  ;;  %281 = vmatpush3.msk.msra.mxu0 %vm99_vm1, %v25_v5  ;;  %v27_v14 = vld [vmem:[%s439_s2 + $0x8] sm:$0xff]  ;;  %v18_v15 = vld [vmem:[%s438_s1 + $0x18] sm:$0xff] }
   0xa   :  { %301 = vmatpush3.msk.msra.mxu1 %vm99_vm1, %v25_v5  ;;  %283 = vmatmul.mubr.msk.f32.vlgmr.msra.gmra.mrb[0].mxu0 %vm74_vm0, %v16_v8  ;;  %v22_v16 = vld [vmem:[%s438_s1 + $0x38] sm:$0xff]  ;;  %v31_v17 = vld [vmem:[%s439_s2 + $0x28] sm:$0xff]  ;;  %v30_v18 = vld [vmem:[%s439_s2 + $0x20] sm:$0xff] }
   0xb   :  { %289 = vmatmul.mubr.msk.f32.vlgmr.msra.gmra.mrb[0].mxu1 %vm74_vm0, %v20_v9  ;;  %285 = vmatprep.mubr.msk.f32.mxu0 %vm74_vm0, %v17_v11  ;;  %v33_v19 = vld [vmem:[%s439_s2 + $0x38] sm:$0xff]  ;;  %v32_v20 = vld [vmem:[%s439_s2 + $0x30] sm:$0xff]  ;;  %s333_s2 = smov [#allocation2]  }
   0xc   :  { %291 = vmatprep.mubr.msk.f32.mxu1 %vm74_vm0, %v21_v12  ;;  %51 = vperm.xlu1 %307, %v29_v13   ;;  %s245_s21 = sshll.u32 %s333_s2, 4  ;;  %s246_s21 = int_to_ptr.vmem [resolvable:$true] %s245_s21 }
   0xd   :  { %41 = vperm.xlu0 %306, %v27_v14   ;;  %s308_s22 = scalar_lea.vmem %s246_s21, 1024  ;;  %p313_p1 = scmp.lt.s32.totalorder %s246_s21, %s246_s21 }
   0xe   :  { %286 = vmatmul.mubr.msk.f32.gmra.mrb[2].mxu0 %vm74_vm0, %v18_v15  ;;  %p309_p0 = scmp.ne.s32.totalorder %s246_s21, %s308_s22  ;;  %p314_p2 = scmp.lt.s32.totalorder %s308_s22, %s308_s22 }
   0xf   :  { %292 = vmatmul.mubr.msk.f32.gmra.mrb[2].mxu1 %vm74_vm0, %v22_v16 }
  0x10   :  { %61 = vperm.xlu1 %307, %v31_v17   ;;  %p315_p3 = por %p314_p2, %p313_p1 }
  0x11   :  { %56 = vperm.xlu0 %306, %v30_v18  }
  0x12   :  { %p316_p4 = pnand %p315_p3, %p309_p0 }
  0x14   :  { %71 = vperm.xlu1 %307, %v33_v19  }
  0x15   :  { %66 = vperm.xlu0 %306, %v32_v20  }
  0x87   :  { %v47_v21 = vpop.permute.xlu1 %46  ;;  %v37_v22 = vpop.permute.xlu0 %36 }
  0x8b   :  { %v52_v23 = vpop.permute.xlu1 %51 }
  0x8c   :  { %v42_v24 = vpop.permute.xlu0 %41 }
  0x8f   :  { %v62_v25 = vpop.permute.xlu1 %61 }
  0x90   :  { %v57_v26 = vpop.permute.xlu0 %56 }
  0x93   :  { %v72_v37 = vpop.permute.xlu1 %71 }
  0x94   :  { %v67_v38 = vpop.permute.xlu0 %66 }
  0xdd   :  { %v284_v27 = vpop.f32.mrb[0].mxu0 }
  0xde   :  { %v290_v28 = vpop.f32.mrb[0].mxu1  ;;  %v175_v29 = vadd.f32 %v284_v27, %v42_v24  ;;  %v169_v31 = vpop.f32.mrb[1].mxu0 }
  0xdf   :  { %v195_v30 = vadd.f32 %v290_v28, %v62_v25  ;;  %v189_v32 = vpop.f32.mrb[1].mxu1  ;;  %v170_v33 = vadd.f32 %v169_v31, %v37_v22 }
  0xe0   :  { %v190_v34 = vadd.f32 %v189_v32, %v57_v26  ;;  %vm209_vm2 = vcmp.gt.f32.partialorder %v175_v29, 0.0  ;;  %v217_v35 = vmul.f32 -0.1, %v175_v29 }
  0xe1   :  { %vm213_vm3 = vcmp.gt.f32.partialorder %v195_v30, 0.0  ;;  %v221_v36 = vmul.f32 -0.1, %v195_v30  ;;  %vm208_vm4 = vcmp.gt.f32.partialorder %v170_v33, 0.0  ;;  %v216_v39 = vmul.f32 -0.1, %v170_v33 }
  0xe2   :  { %vm212_vm5 = vcmp.gt.f32.partialorder %v190_v34, 0.0  ;;  %v220_v40 = vmul.f32 -0.1, %v190_v34  ;;  %v225_v41 = vsel %vm209_vm2, %v175_v29, %v217_v35  ;;  %v287_v43 = vpop.f32.mrb[2].mxu0  ;;  %v293_v44 = vpop.f32.mrb[2].mxu1 }
  0xe3   :  { %v229_v42 = vsel %vm213_vm3, %v195_v30, %v221_v36  ;;  %233 = vst [vmem:[#allocation2 + $0x8] sm:$0xff] %v225_v41  ;;  %v224_v45 = vsel %vm208_vm4, %v170_v33, %v216_v39  ;;  %v185_v47 = vadd.f32 %v287_v43, %v52_v23  ;;  %v205_v48 = vadd.f32 %v293_v44, %v72_v37  ;;  %v179_v49 = vpop.f32.mrb[3].mxu0  ;;  %v199_v50 = vpop.f32.mrb[3].mxu1 }
  0xe4   :  { %237 = vst [vmem:[#allocation2 + $0x28] sm:$0xff] %v229_v42  ;;  %v228_v46 = vsel %vm212_vm5, %v190_v34, %v220_v40  ;;  %232 = vst [vmem:[#allocation2] sm:$0xff] %v224_v45  ;;  %v180_v51 = vadd.f32 %v179_v49, %v47_v21  ;;  %v200_v52 = vadd.f32 %v199_v50, %v67_v38 }
  0xe5   :  { %236 = vst [vmem:[#allocation2 + $0x20] sm:$0xff] %v228_v46  ;;  %vm211_vm6 = vcmp.gt.f32.partialorder %v185_v47, 0.0  ;;  %v219_v53 = vmul.f32 -0.1, %v185_v47  ;;  %vm215_vm7 = vcmp.gt.f32.partialorder %v205_v48, 0.0 }
  0xe6   :  { %v223_v54 = vmul.f32 -0.1, %v205_v48  ;;  %vm210_vm8 = vcmp.gt.f32.partialorder %v180_v51, 0.0  ;;  %v218_v55 = vmul.f32 -0.1, %v180_v51  ;;  %vm214_vm9 = vcmp.gt.f32.partialorder %v200_v52, 0.0 }
  0xe7   :  { %v222_v56 = vmul.f32 -0.1, %v200_v52  ;;  %v227_v57 = vsel %vm211_vm6, %v185_v47, %v219_v53 }
  0xe8   :  { %v231_v58 = vsel %vm215_vm7, %v205_v48, %v223_v54  ;;  %235 = vst [vmem:[#allocation2 + $0x18] sm:$0xff] %v227_v57  ;;  %v226_v59 = vsel %vm210_vm8, %v180_v51, %v218_v55 }
  0xe9   :  { %239 = vst [vmem:[#allocation2 + $0x38] sm:$0xff] %v231_v58  ;;  %v230_v60 = vsel %vm214_vm9, %v200_v52, %v222_v56  ;;  %234 = vst [vmem:[#allocation2 + $0x10] sm:$0xff] %v226_v59 }
  0xea   :  { %238 = vst [vmem:[#allocation2 + $0x30] sm:$0xff] %v230_v60 }
  0xeb   :  { %319 = shalt.err (!%p316_p4)
}
  0xec   :  { %s320_s25 = scalar_lea.hbm %s440_s3, 1024 }
  0xed   :  { %p321_p5 = scmp.ne.s32.totalorder %s440_s3, %s320_s25  ;;  %p324_p6 = scmp.lt.u32.totalorder %s320_s25, %s440_s3 }
  0xef   :  { %p326_p7 = pnand %p324_p6, %p321_p5 }
  0xf1   :  { %329 = shalt.err (!%p326_p7)
}
  0xf2   :  { %s334_s29 = smov 128   ;;  %s335_s30 = smov 8  }
  0xf3   :  { %251 = dma.vmem_to_hbm [thread:$0]  %s246_s21, 1024, %s440_s3, [#allocation3], %s334_s29, %s334_s29, %s335_s30  }
  0xf4   :  { %330 = dma.done.wait [#allocation3], 1024  }
  0xf5   :  { %331 = vsyncadd [#allocation3], 4294966272 }
  0xf6   :  { %255 = vsyncpa [#allocation3], 1 }

</bundles_post_ra>
